<compile_context>
chip_gen: v6e
topology: v6e:2x2x1
jax: 0.10.0
libtpu: 0.0.40
codegen_flags: <defaults>
</compile_context>

<pallas_src>
import math

import jax
import jax.numpy as jnp
from jax.experimental import pallas as pl
from jax.experimental.pallas import tpu as pltpu


def _identity_kernel(x_ref, o_ref):
    # The empty Net.forward(): no compute.  Pass the tile through unchanged.
    o_ref[...] = x_ref[...]


def _round_up(x: int, m: int) -> int:
    return ((x + m - 1) // m) * m


def net_forward(x: jax.Array, *, max_lanes: int = 1024, max_tile_rows: int = 1024) -> jax.Array:
    """Pallas lowering of Net.forward (a no-op): identity over the input.

    Works for any input shape/dtype; returns an array identical to `x`.
    """
    orig_shape = x.shape
    dtype = x.dtype
    n = math.prod(orig_shape)

    itemsize = jnp.dtype(dtype).itemsize
    # Minimum second-to-last tile dim: 8 for f32, 16 for bf16, 32 for int8
    # (sub-32-bit dtypes pack along sublanes).
    sub_mult = max(8, 32 // max(itemsize, 1))

    # Lane-dense layout: last dim a multiple of 128, as wide as the data allows
    # while still leaving >= 2*sub_mult rows (so the grid can have >= 2 steps).
    lanes = max_lanes
    while lanes > 128 and n < lanes * 2 * sub_mult:
        lanes //= 2

    rows = _round_up(pl.cdiv(n, lanes), sub_mult)

    # Largest tile that fits comfortably in scoped VMEM on every generation.
    tile_rows = min(max_tile_rows, rows)
    # Prefer >= 2 grid steps when possible so both v7x TensorCores get work.
    if tile_rows == rows and rows >= 2 * sub_mult:
        tile_rows = _round_up(rows // 2, sub_mult)
    rows = _round_up(rows, tile_rows)

    padded = rows * lanes
    flat = x.reshape(-1)
    if padded != n:
        flat = jnp.pad(flat, (0, padded - n))
    x2d = flat.reshape(rows, lanes)

    nbytes = padded * itemsize
    out2d = pl.pallas_call(
        _identity_kernel,
        out_shape=jax.ShapeDtypeStruct((rows, lanes), dtype),
        grid_spec=pltpu.PrefetchScalarGridSpec(
            num_scalar_prefetch=0,
            grid=(rows // tile_rows,),
            in_specs=[pl.BlockSpec((tile_rows, lanes), lambda i: (i, 0))],
            out_specs=pl.BlockSpec((tile_rows, lanes), lambda i: (i, 0)),
        ),
        # Identity: let the output alias the (intermediate) input slab instead
        # of allocating and filling a second HBM buffer.
        input_output_aliases={0: 0},
        compiler_params=pltpu.CompilerParams(
            dimension_semantics=("parallel",),
        ),
        # Advisory: pure memory-bound copy (read + write), zero flops.
        cost_estimate=pl.CostEstimate(
            flops=0, transcendentals=0, bytes_accessed=2 * nbytes
        ),
    )(x2d)

    if padded != n:
        return out2d.reshape(-1)[:n].reshape(orig_shape)
    return out2d.reshape(orig_shape)


class NetPallas:
    """Container mirroring Net: holds (synthetic) submodule params, empty forward."""

    def __init__(self, key: jax.Array):
        # Deterministic, synthetic stand-ins for the submodule parameter trees.
        # Shapes are representative placeholders only — Net.__init__ just stores
        # externally-constructed modules, and Net.forward never touches them.
        k1, k2, k3, k4, k5 = jax.random.split(key, 5)
        self.modules = {
            "reference_unet": {"proj_w": jax.random.normal(k1, (32, 32), jnp.float32)},
            "denoising_unet": {"proj_w": jax.random.normal(k2, (32, 32), jnp.float32)},
            "face_locator": {"conv_w": jax.random.normal(k3, (4, 4, 3, 3), jnp.float32)},
            "imageproj": {"w": jax.random.normal(k4, (32, 32), jnp.float32)},
            "audioproj": {"w": jax.random.normal(k5, (32, 32), jnp.float32)},
        }
        # jit so the padded/reshaped slab is an intermediate and the
        # input_output_aliases donation applies cleanly (no defensive copy).
        self._forward = jax.jit(net_forward)

    def forward(self, x: jax.Array) -> jax.Array:
        # Upstream forward() is empty; we lower it as an identity Pallas kernel.
        return self._forward(x)

    def get_modules(self):
        return self.modules


if __name__ == "__main__":
    key = jax.random.PRNGKey(0)
    k_param, k_x = jax.random.split(key)

    net = NetPallas(k_param)

    # Small representative input: batch=2, channels=4, spatial=16x16 (NCHW).
    x = jax.random.normal(k_x, (2, 4, 16, 16), dtype=jnp.float32)

    y = net.forward(x)
    y = jax.block_until_ready(y)

    # The empty forward must be an exact no-op on the data path.
    assert y.shape == x.shape and y.dtype == x.dtype
    assert bool(jnp.all(y == x))

    print("KERNEL_OK")
</pallas_src>

<mosaic_0001>
module attributes {stable_mosaic.version = 11 : i64} {
  func.func @_identity_kernel(%arg0: i32, %arg1: memref<8x128xf32, #tpu.memory_space<vmem>>, %arg2: memref<8x128xf32, #tpu.memory_space<vmem>>) attributes {dimension_semantics = [#tpu.dimension_semantics<parallel>], iteration_bounds = array<i64: 2>, scalar_prefetch = 0 : i64, scratch_operands = 0 : i64, tpu.core_type = #tpu.core_type<tc>, window_params = [{transform_indices = @transform_0, window_bounds = array<i64: 8, 128>}, {transform_indices = @transform_1, window_bounds = array<i64: 8, 128>}]} {
    %c0 = arith.constant 0 : index
    %c0_0 = arith.constant 0 : index
    %0 = vector.load %arg1[%c0, %c0_0] : memref<8x128xf32, #tpu.memory_space<vmem>>, vector<8x128xf32>
    %c0_1 = arith.constant 0 : index
    %c0_2 = arith.constant 0 : index
    %1 = vector.load %arg2[%c0_1, %c0_2] : memref<8x128xf32, #tpu.memory_space<vmem>>, vector<8x128xf32>
    tpu.vector_store %arg2[%c0_1, %c0_2], %0 {strides = array<i32>} : memref<8x128xf32, #tpu.memory_space<vmem>>, vector<8x128xf32>,
    return
  }
  func.func @transform_0(%arg0: i32) -> (i32, i32) {
    %c0_i32 = arith.constant 0 : i32
    %c0_i32_0 = arith.constant 0 : i32
    return %arg0, %c0_i32 : i32, i32
  }
  func.func @transform_1(%arg0: i32) -> (i32, i32) {
    %c0_i32 = arith.constant 0 : i32
    %c0_i32_0 = arith.constant 0 : i32
    return %arg0, %c0_i32 : i32, i32
  }
}

</mosaic_0001>

<bundles_post_ra>
// kernel: net_forward.1
= control target key start
LH: loop header
LB: loop body
LE: loop exit
PB: predicated region body
PF: predicated region fallthrough
CT: control target
= control target key end

     0   :  { %s188_s6 = smov 0   ;;  %s208_s0 = inlined_call_operand.vmem [shape: f32[16,128], index: 0, kind: input, shape index: {}, may-alias: {0,1}]   ;;  %s209_s1 = inlined_call_operand.vmem [shape: f32[16,128], index: 1, kind: output, shape index: {}, may-alias: {0,1}]  }
   0x1 LB: > { %s167_s7 = sadd.s32 4294967295, %s190_s6   ;;  %p171_p0 = scmp.ge.s32.totalorder %s190_s6, 1  ;;  %s190_s6 = sphi %s188_s6, %s11_s6  }
   0x2   : > { %p86_p1 = scmp.lt.s32.totalorder %s190_s6, 3 }
   0x4   : > { %p87_p2 = pnand %p171_p0, %p86_p1 }
   0x5   : > { %p104_p3 = scmp.lt.s32.totalorder (!%p87_p2), %s167_s7, 1 }
   0x6   : > { %90 = sbr.rel (%p87_p2) target bundleno = 16 (0x10), region = 24 }
   0xb   : > { %s211_s7 = smov (!%p104_p3, %s167_s7), 1 }
   0xc   : > { %s172_s8 = sshll.u32 %s211_s7, 3 }
   0xd   : > { %s107_s11 = scalar_lea.vmem %s208_s0, %s172_s8  ;;  %s111_s14 = scalar_lea.vmem %s209_s1, %s172_s8 }
   0xe   : > { %v112_v0 = vld [vmem:[%s107_s11] sm:$0xff] }
   0xf   : > { %113 = vst [vmem:[%s111_s14] sm:$0xff] %v112_v0 }
  0x10 PF: > { %s11_s6 = sadd.s32 1, %s190_s6  }
  0x11   : > { %p8_p4 = scmp.ge.s32.totalorder %s11_s6, 4  }
  0x13   :  { %10 = sbr.rel (!%p8_p4) target bundleno = 1 (0x1), region = 54 }

</bundles_post_ra>
